<compile_context>
chip_gen: v6e
topology: v6e:2x2x1
jax: 0.10.0
libtpu: 0.0.40
codegen_flags: <defaults>
</compile_context>

<pallas_src>
import functools
import math

import numpy as np

import jax
import jax.numpy as jnp
from jax.experimental import pallas as pl
from jax.experimental.pallas import tpu as pltpu


def _round_up(x, m):
    return ((x + m - 1) // m) * m


def _choose_block_rows(rows_g, lanes, itemsize, max_block_rows):
    """Pick the row-tile so each output block is ~2 MiB (clamped / v7x-safe)."""
    TARGET = 2 * 1024 * 1024   # ~2 MiB output block: 85%+ of HBM roofline
    CAP = 8 * 1024 * 1024      # hard cap so 2x-buffered blocks fit v7x VMEM
    per_row = itemsize * lanes
    br = TARGET // per_row
    br = max(br, 512)                       # amortize ~0.35us per-grid-step overhead
    br = min(br, max(CAP // per_row, 8))    # VMEM budget
    br = min(br, max_block_rows)
    br = min(br, rows_g)                    # don't exceed the array
    br = max(br, 8)
    return _round_up(br, 8)                 # f32 sublane multiple


def _temporal_encoding_kernel(div, k, E, ts_ref, w_ref, b_ref, o_ref):
    # ts_ref: (br, k)   w_ref/b_ref: (1, k*E)   o_ref: (br, k*E)
    ts = ts_ref[...]
    w = w_ref[...]
    b = b_ref[...]
    br = ts.shape[0]
    if k == 1:
        # (br, 1) broadcasts against (1, E) directly.
        ts_exp = ts
    else:
        # Lane-dense packing: column c of the output corresponds to original
        # row offset c // E.  Build the per-lane timestamp with a handful of
        # broadcasts + selects (pure VPU, no relayout / gather).
        kE = k * E
        lane = jax.lax.broadcasted_iota(jnp.int32, (br, kE), 1)
        ts_exp = jnp.broadcast_to(ts[:, 0:1], (br, kE))
        for j in range(1, k):
            col = jnp.broadcast_to(ts[:, j:j + 1], (br, kE))
            ts_exp = jnp.where(lane >= j * E, col, ts_exp)
    phase = ts_exp * w + b
    o_ref[...] = (div * jnp.cos(phase)).astype(o_ref.dtype)


def temporal_encoding(timestamp, w, b, *, out_dtype=jnp.float32,
                      max_block_rows=8192):
    """timestamp: (B, S) float; w, b: (E,) float32 -> (B, S, E) out_dtype."""
    B, S = timestamp.shape
    E = int(w.shape[0])
    div = math.sqrt(1.0 / E)
    rows = B * S

    # Lane packing factor: fold k consecutive rows into the lane axis when it
    # makes the output last dim exactly 128 lanes (unmasked stores).
    if E < 128 and 128 % E == 0 and rows % (128 // E) == 0:
        k = 128 // E
    else:
        k = 1
    lanes = k * E
    rows_g = rows // k

    ts2 = timestamp.reshape(rows_g, k).astype(jnp.float32)       # metadata-only
    w2 = jnp.tile(w.astype(jnp.float32).reshape(1, E), (1, k))   # (1, k*E), tiny
    b2 = jnp.tile(b.astype(jnp.float32).reshape(1, E), (1, k))

    itemsize = jnp.dtype(out_dtype).itemsize
    br = _choose_block_rows(rows_g, lanes, itemsize, max_block_rows)
    grid = (pl.cdiv(rows_g, br),)   # ragged final block handled by Pallas

    kernel = functools.partial(_temporal_encoding_kernel, div, k, E)

    out = pl.pallas_call(
        kernel,
        out_shape=jax.ShapeDtypeStruct((rows_g, lanes), out_dtype),
        grid=grid,
        in_specs=[
            pl.BlockSpec((br, k), lambda i: (i, 0)),       # timestamps, row-tiled
            pl.BlockSpec((1, lanes), lambda i: (0, 0)),    # w, resident
            pl.BlockSpec((1, lanes), lambda i: (0, 0)),    # b, resident
        ],
        out_specs=pl.BlockSpec((br, lanes), lambda i: (i, 0)),
        compiler_params=pltpu.CompilerParams(
            dimension_semantics=("parallel",),
            vmem_limit_bytes=32 * 1024 * 1024,
        ),
        cost_estimate=pl.CostEstimate(
            flops=3 * rows * E,                 # mul + add + final scale
            transcendentals=rows * E,           # one cos per element
            bytes_accessed=4 * rows + itemsize * rows * E + 2 * 4 * lanes,
        ),
    )(ts2, w2, b2)

    # (rows_g, k*E) and (B, S, E) share the same row-major element order.
    return out.reshape(B, S, E)


def temporal_encoding_ref(timestamp, w, b):
    E = w.shape[0]
    div = math.sqrt(1.0 / E)
    return div * jnp.cos(
        timestamp[..., None].astype(jnp.float32)
        * w.reshape(1, 1, -1) + b.reshape(1, 1, -1)
    )


def _make_params(E):
    w = jnp.asarray(1.0 / 10.0 ** np.linspace(0.0, 9.0, E), dtype=jnp.float32)
    b = jnp.zeros((E,), dtype=jnp.float32)
    return w, b


if __name__ == "__main__":
    rtol, atol = 1e-5, 2e-5

    # --- Test 1: small shapes, E=32 -> lane-packed path (k=4), single block.
    B, S, E = 2, 8, 32
    w, b = _make_params(E)
    ts = jax.random.uniform(jax.random.PRNGKey(0), (B, S), dtype=jnp.float32,
                            minval=0.0, maxval=1000.0)
    out = jax.block_until_ready(temporal_encoding(ts, w, b))
    ref = temporal_encoding_ref(ts, w, b)
    np.testing.assert_allclose(np.asarray(out), np.asarray(ref), rtol=rtol, atol=atol)

    # --- Test 2: E=128 plain path, multi-block grid with ragged final block.
    B2, S2, E2 = 3, 700, 128          # 2100 rows, br=512 -> 5 blocks, last partial
    w2, b2 = _make_params(E2)
    ts2 = jax.random.uniform(jax.random.PRNGKey(1), (B2, S2), dtype=jnp.float32,
                             minval=0.0, maxval=1000.0)
    out2 = jax.block_until_ready(temporal_encoding(ts2, w2, b2, max_block_rows=512))
    ref2 = temporal_encoding_ref(ts2, w2, b2)
    np.testing.assert_allclose(np.asarray(out2), np.asarray(ref2), rtol=rtol, atol=atol)

    # --- Test 3: E=32 lane-packed path, multi-block grid with ragged final block.
    ts3 = jax.random.uniform(jax.random.PRNGKey(2), (3, 700), dtype=jnp.float32,
                             minval=0.0, maxval=1000.0)
    out3 = jax.block_until_ready(temporal_encoding(ts3, w, b, max_block_rows=256))
    ref3 = temporal_encoding_ref(ts3, w, b)
    np.testing.assert_allclose(np.asarray(out3), np.asarray(ref3), rtol=rtol, atol=atol)

    # --- Test 4: rows not divisible by the packing factor -> plain fallback path.
    ts4 = jax.random.uniform(jax.random.PRNGKey(3), (2, 9), dtype=jnp.float32,
                             minval=0.0, maxval=1000.0)
    out4 = jax.block_until_ready(temporal_encoding(ts4, w, b))
    ref4 = temporal_encoding_ref(ts4, w, b)
    np.testing.assert_allclose(np.asarray(out4), np.asarray(ref4), rtol=rtol, atol=atol)

    # --- Test 5: optional bf16 output path (halves HBM writeback on v5e/v6e).
    out5 = jax.block_until_ready(
        temporal_encoding(ts, w, b, out_dtype=jnp.bfloat16))
    np.testing.assert_allclose(np.asarray(out5, dtype=np.float32), np.asarray(ref),
                               rtol=2e-2, atol=5e-3)

    print("KERNEL_OK")
</pallas_src>

<mosaic_0001>
module attributes {stable_mosaic.version = 11 : i64} {
  func.func @_temporal_encoding_kernel(%arg0: i32, %arg1: memref<8x4xf32, #tpu.memory_space<vmem>>, %arg2: memref<1x128xf32, #tpu.memory_space<vmem>>, %arg3: memref<1x128xf32, #tpu.memory_space<vmem>>, %arg4: memref<8x128xf32, #tpu.memory_space<vmem>>) attributes {dimension_semantics = [#tpu.dimension_semantics<parallel>], iteration_bounds = array<i64: 1>, scalar_prefetch = 0 : i64, scratch_operands = 0 : i64, tpu.core_type = #tpu.core_type<tc>, window_params = [{transform_indices = @transform_0, window_bounds = array<i64: 8, 4>}, {pipeline_mode = #tpu.pipeline_mode<synchronous>, transform_indices = @transform_1, window_bounds = array<i64: 1, 128>}, {pipeline_mode = #tpu.pipeline_mode<synchronous>, transform_indices = @transform_2, window_bounds = array<i64: 1, 128>}, {transform_indices = @transform_3, window_bounds = array<i64: 8, 128>}]} {
    %c0 = arith.constant 0 : index
    %c0_0 = arith.constant 0 : index
    %0 = vector.load %arg1[%c0, %c0_0] : memref<8x4xf32, #tpu.memory_space<vmem>>, vector<8x4xf32>
    %c0_1 = arith.constant 0 : index
    %c0_2 = arith.constant 0 : index
    %1 = vector.load %arg2[%c0_1, %c0_2] : memref<1x128xf32, #tpu.memory_space<vmem>>, vector<1x128xf32>
    %c0_3 = arith.constant 0 : index
    %c0_4 = arith.constant 0 : index
    %2 = vector.load %arg3[%c0_3, %c0_4] : memref<1x128xf32, #tpu.memory_space<vmem>>, vector<1x128xf32>
    %3 = tpu.iota {dimensions = array<i32: 1>} : vector<8x128xi32>
    %4 = vector.extract_strided_slice %0 {offsets = [0, 0], sizes = [8, 1], strides = [1, 1]} : vector<8x4xf32> to vector<8x1xf32>
    %5 = vector.shape_cast %4 : vector<8x1xf32> to vector<8x1xf32>
    %6 = vector.broadcast %5 : vector<8x1xf32> to vector<8x128xf32>
    %7 = vector.extract_strided_slice %0 {offsets = [0, 1], sizes = [8, 1], strides = [1, 1]} : vector<8x4xf32> to vector<8x1xf32>
    %8 = vector.shape_cast %7 : vector<8x1xf32> to vector<8x1xf32>
    %9 = vector.broadcast %8 : vector<8x1xf32> to vector<8x128xf32>
    %c32_i32 = arith.constant 32 : i32
    %10 = vector.broadcast %c32_i32 : i32 to vector<8x128xi32>
    %11 = arith.cmpi sge, %3, %10 : vector<8x128xi32>
    %12 = arith.select %11, %9, %6 : vector<8x128xi1>, vector<8x128xf32>
    %13 = vector.extract_strided_slice %0 {offsets = [0, 2], sizes = [8, 1], strides = [1, 1]} : vector<8x4xf32> to vector<8x1xf32>
    %14 = vector.shape_cast %13 : vector<8x1xf32> to vector<8x1xf32>
    %15 = vector.broadcast %14 : vector<8x1xf32> to vector<8x128xf32>
    %c64_i32 = arith.constant 64 : i32
    %16 = vector.broadcast %c64_i32 : i32 to vector<8x128xi32>
    %17 = arith.cmpi sge, %3, %16 : vector<8x128xi32>
    %18 = arith.select %17, %15, %12 : vector<8x128xi1>, vector<8x128xf32>
    %19 = vector.extract_strided_slice %0 {offsets = [0, 3], sizes = [8, 1], strides = [1, 1]} : vector<8x4xf32> to vector<8x1xf32>
    %20 = vector.shape_cast %19 : vector<8x1xf32> to vector<8x1xf32>
    %21 = vector.broadcast %20 : vector<8x1xf32> to vector<8x128xf32>
    %c96_i32 = arith.constant 96 : i32
    %22 = vector.broadcast %c96_i32 : i32 to vector<8x128xi32>
    %23 = arith.cmpi sge, %3, %22 : vector<8x128xi32>
    %24 = arith.select %23, %21, %18 : vector<8x128xi1>, vector<8x128xf32>
    %25 = vector.broadcast %1 : vector<1x128xf32> to vector<8x128xf32>
    %26 = arith.mulf %24, %25 : vector<8x128xf32>
    %27 = vector.broadcast %2 : vector<1x128xf32> to vector<8x128xf32>
    %28 = arith.addf %26, %27 : vector<8x128xf32>
    %29 = math.cos %28 : vector<8x128xf32>
    %cst = arith.constant 0.176776692 : f32
    %30 = vector.broadcast %cst : f32 to vector<8x128xf32>
    %31 = arith.mulf %30, %29 : vector<8x128xf32>
    %c0_5 = arith.constant 0 : index
    %c0_6 = arith.constant 0 : index
    %32 = vector.load %arg4[%c0_5, %c0_6] : memref<8x128xf32, #tpu.memory_space<vmem>>, vector<8x128xf32>
    tpu.vector_store %arg4[%c0_5, %c0_6], %31 {strides = array<i32>} : memref<8x128xf32, #tpu.memory_space<vmem>>, vector<8x128xf32>,
    return
  }
  func.func @transform_0(%arg0: i32) -> (i32, i32) {
    %c0_i32 = arith.constant 0 : i32
    %c0_i32_0 = arith.constant 0 : i32
    return %arg0, %c0_i32 : i32, i32
  }
  func.func @transform_1(%arg0: i32) -> (i32, i32) {
    %c0_i32 = arith.constant 0 : i32
    %c0_i32_0 = arith.constant 0 : i32
    %c0_i32_1 = arith.constant 0 : i32
    return %c0_i32, %c0_i32_0 : i32, i32
  }
  func.func @transform_2(%arg0: i32) -> (i32, i32) {
    %c0_i32 = arith.constant 0 : i32
    %c0_i32_0 = arith.constant 0 : i32
    %c0_i32_1 = arith.constant 0 : i32
    return %c0_i32, %c0_i32_0 : i32, i32
  }
  func.func @transform_3(%arg0: i32) -> (i32, i32) {
    %c0_i32 = arith.constant 0 : i32
    %c0_i32_0 = arith.constant 0 : i32
    return %arg0, %c0_i32 : i32, i32
  }
}

</mosaic_0001>

<bundles_post_ra>
// kernel: tpu_custom_call.1
= control target key start
LH: loop header
LB: loop body
LE: loop exit
PB: predicated region body
PF: predicated region fallthrough
CT: control target
= control target key end

     0   :  { %8 = vsyncpa [#allocation3], 0  ;;  %s343_s0 = inlined_call_operand.hbm [shape: f32[4,4], index: 0, kind: input, shape index: {}]   ;;  %s344_s1 = inlined_call_operand.vmem [shape: f32[1,128], index: 1, kind: input, shape index: {}]   ;;  %s345_s2 = inlined_call_operand.vmem [shape: f32[1,128], index: 2, kind: input, shape index: {}]   ;;  %s346_s3 = inlined_call_operand.hbm [shape: f32[4,128], index: 3, kind: output, shape index: {}]  }
   0x1   :  { %9 = vsyncpa [#allocation4], 0 }
   0x2   :  { %14 = vsyncadd [#allocation3], 64  ;;  %s270_s12 = smov [#allocation2]  }
   0x3   :  { %s15_s13 = sshll.u32 %s270_s12, 4  ;;  %s16_s13 = int_to_ptr.vmem [resolvable:$true] %s15_s13 }
   0x4   :  { %s234_s14 = scalar_lea.vmem %s16_s13, 64  ;;  %s238_s15 = scalar_lea.vmem %s16_s13, 128 }
   0x5   :  { %p235_p0 = scmp.ne.s32.totalorder %s16_s13, %s234_s14  ;;  %p239_p1 = scmp.lt.s32.totalorder %s16_s13, %s16_s13 }
   0x6   :  { %p240_p2 = scmp.lt.s32.totalorder %s238_s15, %s234_s14 }
   0x8   :  { %p241_p3 = por %p240_p2, %p239_p1 }
   0xa   :  { %p242_p4 = pnand %p241_p3, %p235_p0 }
   0xc   :  { %245 = shalt.err (!%p242_p4)
}
   0xd   :  { %s271_s16 = smov 64   ;;  %s272_s17 = smov 4  }
   0xe   :  { %21 = dma.hbm_to_vmem [thread:$0]  %s343_s0, 64, %s16_s13, [#allocation3], %s271_s16, %s271_s16, %s272_s17  }
   0xf   :  { %266 = dma.done.wait [#allocation3], 128  }
  0x10   :  { %267 = vsyncadd [#allocation3], 4294967168  ;;  %v273_v0 = vmov 0   ;;  %v274_v1 = vmov 2   ;;  %v29_v2 = vld [vmem:[#allocation2] sm:$0xff]  ;;  %v275_v3 = vmov 1   ;;  %v32_v5 = vlaneseq }
  0x11   :  { %217 = vset.pattern.permute.xlu0 %v273_v0  ;;  %219 = vset.pattern.permute.xlu1 %v274_v1  ;;  %v276_v4 = vmov 3   ;;  %v193_v12 = vld [vmem:[%s344_s1] ss:$0 sm:$0xff]  ;;  %v277_v28 = vmov 683565275  }
  0x12   :  { %36 = vperm.xlu0 %217, %v29_v2   ;;  %46 = vperm.xlu1 %219, %v29_v2   ;;  %v33_v6 = vand.u32 127, %v32_v5  ;;  %v194_v14 = vld [vmem:[%s345_s2] ss:$0 sm:$0xff]  ;;  %v278_v30 = vmov 2475754826  }
  0x13   :  { %v279_v33 = vmov 2131351028   ;;  %v280_v36 = vmov 2102212464   ;;  %v281_v39 = vmov 920167782  }
  0x14   :  { %vm43_vm0 = vcmp.ge.s32.totalorder %v33_v6, 32  ;;  %vm49_vm1 = vcmp.ge.s32.totalorder %v33_v6, 64  ;;  %vm55_vm2 = vcmp.ge.s32.totalorder %v33_v6, 96  ;;  %v282_v42 = vmov 1326507024  }
  0x16   :  { %218 = vset.pattern.permute.xlu0 %v275_v3  ;;  %220 = vset.pattern.permute.xlu1 %v276_v4 }
  0x17   :  { %40 = vperm.xlu0 %218, %v29_v2   ;;  %52 = vperm.xlu1 %220, %v29_v2  }
  0x1b   :  { %221 = vset.pattern.permute.xlu0 %v276_v4 }
  0x8d   :  { %v37_v7 = vpop.permute.xlu0 %36  ;;  %v47_v8 = vpop.permute.xlu1 %46 }
  0x92   :  { %v41_v9 = vpop.permute.xlu0 %40  ;;  %v53_v10 = vpop.permute.xlu1 %52 }
  0x93   :  { %v44_v11 = vsel %vm43_vm0, %v41_v9, %v37_v7 }
  0x94   :  { %v50_v13 = vsel %vm49_vm1, %v47_v8, %v44_v11 }
  0x95   :  { %v56_v15 = vsel %vm55_vm2, %v53_v10, %v50_v13 }
  0x96   :  { %v63_v16 = vmul.f32 %v193_v12, %v56_v15 }
  0x98   :  { %v316_v17 = vadd.f32 %v194_v14, %v63_v16 }
  0x9a   :  { %v74_v18 = vand.u32 2139095040, %v316_v17  ;;  %v71_v22 = vand.u32 2147483647, %v316_v17  ;;  %vm73_vm10 = vcmp.lt.s32.totalorder %v316_v17, 0  ;;  %vm163_vm15 = vweird.f32 %v316_v17 }
  0x9c   :  { %v75_v19 = vshrl.u32 %v74_v18, 23  ;;  %v78_v25 = vand.u32 8388607, %v71_v22  ;;  %vm72_vm11 = vcmp.le.f32.partialorder %v71_v22, 0.7853982 }
  0x9e   :  { %v195_v20 = vadd.s32 4294967169, %v75_v19  ;;  %v79_v44 = vor.u32 8388608, %v78_v25 }
  0xa0   :  { %v81_v21 = vadd.s32 1, %v195_v20  ;;  %v119_v58 = vshll.u32 %v79_v44, 8 }
  0xa2   :  { %vm82_vm3 = vcmp.gt.s32.totalorder %v81_v21, 0 }
  0xa3   :  { %v83_v23 = vsel %vm82_vm3, %v81_v21, 0 }
  0xa4   :  { %v85_v24 = vand.u32 31, %v83_v23  ;;  %v84_v27 = vshrl.u32 %v83_v23, 5 }
  0xa6   :  { %v86_v26 = vsub.s32 32, %v85_v24  ;;  %v88_v29 = vshll.u32 %v277_v28, %v85_v24  ;;  %v91_v31 = vshll.u32 %v278_v30, %v85_v24  ;;  %v94_v35 = vshll.u32 %v279_v33, %v85_v24 }
  0xa7   :  { %v97_v38 = vshll.u32 %v280_v36, %v85_v24  ;;  %v100_v41 = vshll.u32 %v281_v39, %v85_v24  ;;  %vm103_vm4 = vcmp.lt.s32.totalorder %v84_v27, 1  ;;  %vm106_vm5 = vcmp.lt.s32.totalorder %v84_v27, 4 }
  0xa8   :  { %v89_v32 = vshrl.u32 %v278_v30, %v86_v26  ;;  %v92_v34 = vshrl.u32 %v279_v33, %v86_v26  ;;  %v95_v37 = vshrl.u32 %v280_v36, %v86_v26  ;;  %v98_v40 = vshrl.u32 %v281_v39, %v86_v26 }
  0xa9   :  { %v101_v43 = vshrl.u32 %v282_v42, %v86_v26  ;;  %v87_v53 = vshrl.u32 %v277_v28, %v86_v26  ;;  %vm105_vm6 = vcmp.lt.s32.totalorder %v84_v27, 3  ;;  %vm104_vm7 = vcmp.lt.s32.totalorder %v84_v27, 2 }
  0xaa   :  { %v90_v45 = vor.u32 %v89_v32, %v88_v29  ;;  %v93_v46 = vor.u32 %v92_v34, %v91_v31  ;;  %v96_v47 = vor.u32 %v95_v37, %v94_v35  ;;  %v99_v48 = vor.u32 %v98_v40, %v97_v38 }
  0xab   :  { %v102_v49 = vor.u32 %v101_v43, %v100_v41 }
  0xac   :  { %v108_v50 = vsel %vm106_vm5, %v96_v47, 2102212464  ;;  %v111_v51 = vsel %vm103_vm4, %v90_v45, %v93_v46  ;;  %v115_v52 = vsel %vm103_vm4, %v93_v46, %v96_v47  ;;  %v112_v54 = vsel %vm106_vm5, %v99_v48, 920167782 }
  0xad   :  { %v116_v55 = vsel %vm106_vm5, %v102_v49, 1326507024  ;;  %v113_v56 = vsel %vm105_vm6, %v96_v47, %v112_v54  ;;  %v107_v59 = vsel %vm103_vm4, %v87_v53, %v90_v45  ;;  %v109_v60 = vsel %vm105_vm6, %v93_v46, %v108_v50 }
  0xae   :  { %v117_v57 = vsel %vm105_vm6, %v99_v48, %v116_v55  ;;  %v114_v61 = vsel %vm104_vm7, %v111_v51, %v113_v56  ;;  %v110_v3 = vsel %vm104_vm7, %v107_v59, %v109_v60 }
  0xaf   :  { %v118_v62 = vsel %vm104_vm7, %v115_v52, %v117_v57  ;;  %v325_v1 = vmul.u32.u64.low %v119_v58, %v114_v61  ;;  %v326_v2 = vmul.u32.u64.high %v119_v58, %v114_v61, %v325_v1  ;;  %v126_v5 = vmul.u32 %v119_v58, %v110_v3 }
  0xb0   :  { %v322_v63 = vmul.u32.u64.low %v119_v58, %v118_v62  ;;  %v323_v0 = vmul.u32.u64.high %v119_v58, %v118_v62, %v322_v63 }
  0xb1   :  { %v129_v4 = vadd.s32 1, %v326_v2 }
  0xb2   :  { %vm128_vm8 = vc.u32 %v323_v0, %v325_v1  ;;  %v127_v18 = vadd.s32 %v325_v1, %v323_v0 }
  0xb3   :  { %v130_v6 = vsel %vm128_vm8, %v129_v4, %v326_v2 }
  0xb4   :  { %v131_v7 = vadd.s32 %v130_v6, %v126_v5 }
  0xb6   :  { %v132_v8 = vadd.s32 536870912, %v131_v7 }
  0xb8   :  { %v133_v9 = vshrl.u32 %v132_v8, 30 }
  0xba   :  { %v134_v10 = vshll.u32 %v133_v9, 30  ;;  %v157_v34 = vsub.s32 4, %v133_v9 }
  0xbc   :  { %v135_v11 = vsub.s32 %v131_v7, %v134_v10  ;;  %v158_v35 = vsel %vm73_vm10, %v157_v34, %v133_v9 }
  0xbd   :  { %v160_v36 = vsel %vm72_vm11, 0, %v158_v35 }
  0xbe   :  { %v137_v12 = vsub.s32 0, %v135_v11  ;;  %v164_v37 = vand.u32 3, %v160_v36 }
  0xc0   :  { %v196_v13 = vmin.u32 %v137_v12, %v135_v11  ;;  %vm169_vm12 = vcmp.eq.s32.totalorder %v164_v37, 2  ;;  %vm166_vm13 = vcmp.eq.s32.totalorder %v164_v37, 0  ;;  %vm165_vm14 = vcmp.lt.s32.totalorder %v164_v37, 2 }
  0xc2   :  { %v139_v14 = vclz %v196_v13 }
  0xc4   :  { %v197_v15 = vadd.s32 4294967294, %v139_v14 }
  0xc6   :  { %vm198_vm9 = vcmp.lt.s32.totalorder %v197_v15, 0 }
  0xc7   :  { %v142_v16 = vsel %vm198_vm9, 0, %v197_v15 }
  0xc8   :  { %v143_v19 = vsub.s32 32, %v142_v16  ;;  %v147_v20 = vsub.s32 4294967266, %v142_v16  ;;  %v144_v21 = vshll.u32 %v135_v11, %v142_v16 }
  0xca   :  { %v145_v23 = vshrl.u32 %v127_v18, %v143_v19  ;;  %v148_v24 = vadd.s32 127, %v147_v20 }
  0xcc   :  { %v146_v25 = vor.u32 %v145_v23, %v144_v21  ;;  %v149_v26 = vshll.u32 %v148_v24, 23 }
  0xce   :  { %v150_v27 = vor.u32 4788187, %v149_v26  ;;  %v153_v29 = vcvt.s32.f32 %v146_v25 }
  0xd0   :  { %v151_v28 = vand.u32 2147483647, %v150_v27 }
  0xd2   :  { %v154_v30 = vmul.f32 %v153_v29, %v151_v28 }
  0xd4   :  { %v155_v31 = vxor.u32 2147483648, %v154_v30 }
  0xd6   :  { %v156_v32 = vsel %vm73_vm10, %v155_v31, %v154_v30 }
  0xd7   :  { %v159_v33 = vsel %vm72_vm11, %v316_v17, %v156_v32 }
  0xd8   :  { %222 = vcosq.f32 %v159_v33 }
  0xd9   :  { %224 = vsinq.f32 %v159_v33 }
  0xe5   :  { %v223_v38 = vpop.eup %222 }
  0xe6   :  { %v225_v39 = vpop.eup %224  ;;  %v170_v40 = vxor.u32 2147483648, %v223_v38 }
  0xe7   :  { %v167_v41 = vxor.u32 2147483648, %v225_v39 }
  0xe8   :  { %v171_v42 = vsel %vm169_vm12, %v170_v40, %v225_v39 }
  0xe9   :  { %v168_v43 = vsel %vm166_vm13, %v223_v38, %v167_v41 }
  0xea   :  { %v172_v22 = vsel %vm165_vm14, %v168_v43, %v171_v42 }
  0xeb   :  { %v173_v44 = vsel %vm163_vm15, nan, %v172_v22 }
  0xec   :  { %v174_v45 = vmul.f32 0.17677669, %v173_v44 }
  0xee   :  { %175 = vst [vmem:[#allocation5] sm:$0xff] %v174_v45 }
  0xef   :  { %180 = vsyncadd [#allocation4], 64  ;;  %s283_s1 = smov [#allocation5]  }
  0xf0   :  { %s181_s2 = sshll.u32 %s283_s1, 4  ;;  %s182_s2 = int_to_ptr.vmem [resolvable:$true] %s181_s2 }
  0xf1   :  { %s246_s23 = scalar_lea.vmem %s182_s2, 64  ;;  %s250_s24 = scalar_lea.vmem %s182_s2, 128 }
  0xf2   :  { %p247_p5 = scmp.ne.s32.totalorder %s182_s2, %s246_s23  ;;  %p251_p6 = scmp.lt.s32.totalorder %s182_s2, %s182_s2 }
  0xf3   :  { %p252_p7 = scmp.lt.s32.totalorder %s250_s24, %s246_s23 }
  0xf5   :  { %p253_p8 = por %p252_p7, %p251_p6 }
  0xf7   :  { %p254_p9 = pnand %p253_p8, %p247_p5 }
  0xf9   :  { %257 = shalt.err (!%p254_p9)
}
  0xfa   :  { %187 = dma.vmem_to_hbm [thread:$0]  %s182_s2, 64, %s346_s3, [#allocation4], %s271_s16, %s271_s16, %s272_s17  }
  0xfb   :  { %268 = dma.done.wait [#allocation4], 128  }
  0xfc   :  { %269 = vsyncadd [#allocation4], 4294967168 }
  0xfd   :  { %191 = vsyncpa [#allocation3], 1 }
  0xfe   :  { %192 = vsyncpa [#allocation4], 1 }

</bundles_post_ra>
